<compile_context>
chip_gen: v6e
topology: v6e:2x2x1
jax: 0.10.0
libtpu: 0.0.40
codegen_flags: <defaults>
</compile_context>

<pallas_src>
import os
import numpy as np
import jax
import jax.numpy as jnp
from jax.experimental import pallas as pl
from jax.experimental.pallas import tpu as pltpu


# ----------------------------------------------------------------------------
# Pallas kernel: fused masked reduction + row selection for one query.
# ----------------------------------------------------------------------------
def _gt_select_kernel(q_ref, fid_ref, annot_ref, out_ref):
    # q_ref: int32[Q] in SMEM (scalar-prefetch); one query per grid step.
    q = q_ref[pl.program_id(0)]

    fid = fid_ref[...]                               # (1, 128) int32 frame ids
    valid = fid >= 0                                 # padding lanes carry -1

    # Fused reduction: max over {fid | fid <= q}. Returns q if the exact frame
    # exists, else the closest previous frame, else -1 (matches nothing valid).
    eff = jnp.max(jnp.where(jnp.logical_and(fid <= q, valid), fid, -1))

    sel = jnp.logical_and(fid == eff, valid)         # (1, 128) bool

    # annot_ref row layout (sublanes): [x1, y1, x2, y2, cls, valid_marker, 0, 0]
    # Row 5 holds 1 for real rows, so the masked select also writes the
    # selection mask into row 5 of the output -> single lane-dense store.
    out_ref[...] = jnp.where(sel, annot_ref[...], 0)  # (8, 128)


def gt_detect_kernel_call(queries, frame_ids, annots):
    """queries: int32[Q]; frame_ids: int32[1, N]; annots: int32[8, N] (N=128)."""
    Q = queries.shape[0]
    C, N = annots.shape
    return pl.pallas_call(
        _gt_select_kernel,
        grid_spec=pltpu.PrefetchScalarGridSpec(
            num_scalar_prefetch=1,                   # queries -> SMEM
            grid=(Q,),
            in_specs=[
                pl.BlockSpec((1, N), lambda i, q: (0, 0)),   # frame ids (shared)
                pl.BlockSpec((C, N), lambda i, q: (0, 0)),   # annot slab (shared)
            ],
            out_specs=pl.BlockSpec((pl.Squeezed(), C, N), lambda i, q: (i, 0, 0)),
        ),
        out_shape=jax.ShapeDtypeStruct((Q, C, N), jnp.int32),
        compiler_params=pltpu.CompilerParams(
            dimension_semantics=("parallel",)),      # shard queries on v7x 2-TC
    )(queries, frame_ids, annots)


# ----------------------------------------------------------------------------
# Glue: mirrors GTdetector's python-side behaviour with in-memory annotations.
# ----------------------------------------------------------------------------
class GTdetectorPallas:
    CLASS_NAMES = ["person", "car", "bike", "dog"]

    def __init__(self, annotations_by_video, n_pad=128):
        # annotations_by_video: {video_id: list[(frame, x1, y1, x2, y2, cls_id)]}
        # TODO(synk): file IO (`open(annot_path)`) and the annotation text-format
        # parsing have no Pallas equivalent; annotations are supplied in-memory.
        assert n_pad % 128 == 0, "keep the lane axis a multiple of 128"
        self.n_pad = n_pad
        self.cache = {}
        self._raw = annotations_by_video

    def _load_annotations(self, video_id):
        if video_id in self.cache:
            return self.cache[video_id]
        rows = self._raw[video_id]
        assert len(rows) <= self.n_pad
        fids = np.full((1, self.n_pad), -1, dtype=np.int32)
        slab = np.zeros((8, self.n_pad), dtype=np.int32)
        for j, (f, x1, y1, x2, y2, c) in enumerate(rows):
            fids[0, j] = f
            slab[0, j], slab[1, j], slab[2, j], slab[3, j] = x1, y1, x2, y2
            slab[4, j] = c
            slab[5, j] = 1          # validity marker -> output selection mask
        packed = (jnp.asarray(fids), jnp.asarray(slab))
        self.cache[video_id] = packed
        return packed

    @staticmethod
    def _parse_path(frame_path):
        # TODO(synk): os.sep splitting / zfill string handling stays in python.
        parts = frame_path.split(os.sep)
        video_id = parts[-2]
        frame_num = int(os.path.splitext(parts[-1])[0])
        return video_id, frame_num

    def forward_batch(self, frame_paths):
        """Batched forward: one kernel dispatch + one host sync per video."""
        by_video = {}
        for idx, p in enumerate(frame_paths):
            video_id, frame_num = self._parse_path(p)
            by_video.setdefault(video_id, []).append((idx, frame_num))

        results = [None] * len(frame_paths)
        for video_id, items in by_video.items():
            frame_ids, annots = self._load_annotations(video_id)
            queries = jnp.asarray([f for _, f in items], dtype=jnp.int32)
            out = gt_detect_kernel_call(queries, frame_ids, annots)
            out = np.asarray(jax.block_until_ready(out))   # single sync per batch
            for (idx, _), slab in zip(items, out):
                sel_cols = np.nonzero(slab[5] == 1)[0]
                bboxes = []
                for j in sel_cols:
                    x1, y1, x2, y2, cls_id = (int(slab[0, j]), int(slab[1, j]),
                                              int(slab[2, j]), int(slab[3, j]),
                                              int(slab[4, j]))
                    bboxes.append((x1, y1, x2, y2, self.CLASS_NAMES[cls_id]))
                results[idx] = bboxes
        return results

    def forward(self, frame_path):
        return self.forward_batch([frame_path])[0]


# ----------------------------------------------------------------------------
# Main: deterministic synthetic annotations, run kernel, verify.
# ----------------------------------------------------------------------------
if __name__ == "__main__":
    key = jax.random.PRNGKey(0)
    k1, k2 = jax.random.split(key)

    # 6 annotated objects over frames {1, 3, 3, 3, 5, 7} of one video.
    frame_list = [1, 3, 3, 3, 5, 7]
    coords = jax.random.randint(k1, (len(frame_list), 4), 0, 256, dtype=jnp.int32)
    classes = jax.random.randint(k2, (len(frame_list),), 0, 4, dtype=jnp.int32)
    rows = [
        (int(f), int(coords[i, 0]), int(coords[i, 1]),
         int(coords[i, 2]), int(coords[i, 3]), int(classes[i]))
        for i, f in enumerate(frame_list)
    ]
    detector = GTdetectorPallas({"vid0001": rows}, n_pad=128)

    # Batched: frame 4 -> fallback to frame 3; frame 5 -> exact; frame 0 -> empty.
    paths = [
        os.path.join("data", "vid0001", "000004.jpg"),
        os.path.join("data", "vid0001", "000005.jpg"),
        os.path.join("data", "vid0001", "000000.jpg"),
    ]
    boxes_fallback, boxes_exact, boxes_empty = detector.forward_batch(paths)

    expected_fallback = [
        (r[1], r[2], r[3], r[4], GTdetectorPallas.CLASS_NAMES[r[5]])
        for r in rows if r[0] == 3
    ]
    expected_exact = [
        (r[1], r[2], r[3], r[4], GTdetectorPallas.CLASS_NAMES[r[5]])
        for r in rows if r[0] == 5
    ]

    assert boxes_fallback == expected_fallback, (boxes_fallback, expected_fallback)
    assert boxes_exact == expected_exact, (boxes_exact, expected_exact)
    assert boxes_empty == []

    # Single-path forward() still matches the batched result.
    assert detector.forward(paths[0]) == expected_fallback

    print("KERNEL_OK")
</pallas_src>

<mosaic_0001>
module attributes {stable_mosaic.version = 11 : i64} {
  func.func @_gt_select_kernel(%arg0: i32, %arg1: memref<3xi32, #tpu.memory_space<smem>>, %arg2: memref<1x128xi32, #tpu.memory_space<vmem>>, %arg3: memref<8x128xi32, #tpu.memory_space<vmem>>, %arg4: memref<1x8x128xi32, #tpu.memory_space<vmem>>) attributes {dimension_semantics = [#tpu.dimension_semantics<parallel>], iteration_bounds = array<i64: 3>, scalar_prefetch = 1 : i64, scratch_operands = 0 : i64, tpu.core_type = #tpu.core_type<tc>, window_params = [{pipeline_mode = #tpu.pipeline_mode<synchronous>, transform_indices = @transform_0, window_bounds = array<i64: 1, 128>}, {pipeline_mode = #tpu.pipeline_mode<synchronous>, transform_indices = @transform_1, window_bounds = array<i64: 8, 128>}, {transform_indices = @transform_2, window_bounds = array<i64: 1, 8, 128>}]} {
    %0 = arith.index_cast %arg0 : i32 to index
    %1 = memref.load %arg1[%0] : memref<3xi32, #tpu.memory_space<smem>>
    %c0 = arith.constant 0 : index
    %c0_0 = arith.constant 0 : index
    %2 = vector.load %arg2[%c0, %c0_0] : memref<1x128xi32, #tpu.memory_space<vmem>>, vector<1x128xi32>
    %c0_i32 = arith.constant 0 : i32
    %3 = vector.broadcast %c0_i32 : i32 to vector<1x128xi32>
    %4 = arith.cmpi sge, %2, %3 : vector<1x128xi32>
    %5 = vector.broadcast %1 : i32 to vector<1x128xi32>
    %6 = arith.cmpi sle, %2, %5 : vector<1x128xi32>
    %7 = arith.andi %6, %4 : vector<1x128xi1>
    %c-1_i32 = arith.constant -1 : i32
    %8 = vector.broadcast %c-1_i32 : i32 to vector<1x128xi32>
    %9 = arith.select %7, %2, %8 : vector<1x128xi1>, vector<1x128xi32>
    %10 = vector.shape_cast %9 : vector<1x128xi32> to vector<1x1x128xi32>
    %cst = arith.constant dense<-2147483648> : vector<1xi32>
    %11 = vector.multi_reduction <maxsi>, %10, %cst [1, 2] : vector<1x1x128xi32> to vector<1xi32>
    %12 = vector.shape_cast %11 : vector<1xi32> to vector<1x1x1xi32>
    %13 = vector.extract %12[0, 0, 0] : i32 from vector<1x1x1xi32>
    %14 = vector.broadcast %13 : i32 to vector<1x128xi32>
    %15 = arith.cmpi eq, %2, %14 : vector<1x128xi32>
    %16 = arith.andi %15, %4 : vector<1x128xi1>
    %c0_1 = arith.constant 0 : index
    %c0_2 = arith.constant 0 : index
    %17 = vector.load %arg3[%c0_1, %c0_2] : memref<8x128xi32, #tpu.memory_space<vmem>>, vector<8x128xi32>
    %c0_i32_3 = arith.constant 0 : i32
    %18 = vector.shape_cast %16 : vector<1x128xi1> to vector<1x128xi1>
    %19 = vector.broadcast %18 : vector<1x128xi1> to vector<8x128xi1>
    %20 = vector.broadcast %c0_i32_3 : i32 to vector<8x128xi32>
    %21 = arith.select %19, %17, %20 : vector<8x128xi1>, vector<8x128xi32>
    %c0_4 = arith.constant 0 : index
    %c0_5 = arith.constant 0 : index
    %c0_6 = arith.constant 0 : index
    %22 = vector.load %arg4[%c0_4, %c0_5, %c0_6] : memref<1x8x128xi32, #tpu.memory_space<vmem>>, vector<1x8x128xi32>
    %23 = vector.shape_cast %22 : vector<1x8x128xi32> to vector<8x128xi32>
    %24 = vector.shape_cast %21 : vector<8x128xi32> to vector<1x8x128xi32>
    tpu.vector_store %arg4[%c0_4, %c0_5, %c0_6], %24 {strides = array<i32>} : memref<1x8x128xi32, #tpu.memory_space<vmem>>, vector<1x8x128xi32>,
    return
  }
  func.func @transform_0(%arg0: i32, %arg1: memref<3xi32, #tpu.memory_space<smem>>) -> (i32, i32) {
    %c0_i32 = arith.constant 0 : i32
    %c0_i32_0 = arith.constant 0 : i32
    %c0_i32_1 = arith.constant 0 : i32
    return %c0_i32, %c0_i32_0 : i32, i32
  }
  func.func @transform_1(%arg0: i32, %arg1: memref<3xi32, #tpu.memory_space<smem>>) -> (i32, i32) {
    %c0_i32 = arith.constant 0 : i32
    %c0_i32_0 = arith.constant 0 : i32
    %c0_i32_1 = arith.constant 0 : i32
    return %c0_i32, %c0_i32_0 : i32, i32
  }
  func.func @transform_2(%arg0: i32, %arg1: memref<3xi32, #tpu.memory_space<smem>>) -> (i32, i32, i32) {
    %c0_i32 = arith.constant 0 : i32
    %c0_i32_0 = arith.constant 0 : i32
    %c0_i32_1 = arith.constant 0 : i32
    return %arg0, %c0_i32, %c0_i32_0 : i32, i32, i32
  }
}

</mosaic_0001>

<bundles_post_ra>
// kernel: tpu_custom_call.1
= control target key start
LH: loop header
LB: loop body
LE: loop exit
PB: predicated region body
PF: predicated region fallthrough
CT: control target
= control target key end

     0   :  { %s424_s12 = smov [#allocation3]   ;;  %s563_s0 = inlined_call_operand.hbm [shape: s32[3], index: 0, kind: input, shape index: {}]   ;;  %s564_s1 = inlined_call_operand.vmem [shape: s32[1,128], index: 1, kind: input, shape index: {}]   ;;  %s565_s2 = inlined_call_operand.hbm [shape: s32[8,128], index: 2, kind: input, shape index: {}]   ;;  %s566_s3 = inlined_call_operand.hbm [shape: s32[3,8,128], index: 3, kind: output, shape index: {}]  }
   0x1   :  { %9 = dma.hbm_to_smem %s563_s0, 16, %s424_s12, [#allocation2] }
   0x2   :  { %398 = dma.done.wait [#allocation2], 16 }
   0x3   :  { %399 = vsyncadd [#allocation2], 4294967280 }
   0x4   :  { %11 = sfence }
   0x5   :  { %12 = vsyncpa [#allocation5], 0 }
   0x6   :  { %13 = vsyncpa [#allocation6], 0 }
   0x7   :  { %15 = vsyncpa [#allocation6 + $0x1], 0  ;;  %s451_s15 = smov 0   ;;  %s453_s16 = smov 0  }
   0x8   :  { %s455_s17 = smov 0   ;;  %s457_s18 = smov 0  }
   0x9 LB: > { %s472_s0 = sadd.s32 4294967295, %s422_s18   ;;  %s258_s19 = sadd.s32 4294967294, %s422_s18   ;;  %s422_s18 = sphi %s457_s18, %s574_s18   ;;  %s418_s17 = sphi %s455_s17, %s573_s17   ;;  %s414_s16 = sphi %s453_s16, %s572_s16   ;;  %s410_s15 = sphi %s451_s15, %s571_s15  }
   0xa   : > { %s476_s20 = sadd.s32 1, %s422_s18   ;;  %s70_s21 = sadd.s32 1, %s418_s17 }
   0xb   : > { %s67_s22 = ssub.s32 %s422_s18, %s476_s20  ;;  %p80_p0 = scmp.ne.s32.totalorder %s418_s17, %s414_s16 }
   0xc   : > { %p68_p1 = scmp.eq.s32.totalorder %s67_s22, 0  ;;  %p81_p2 = scmp.eq.s32.totalorder %s472_s0, 2 }
   0xd   : > { %p86_p3 = scmp.ne.s32.totalorder %s414_s16, %s410_s15  ;;  %p87_p4 = scmp.eq.s32.totalorder %s258_s19, 2 }
   0xe   : > { %s487_s23 = scalar_select %p68_p1, %s418_s17, %s70_s21  }
   0xf   : > { %p489_p5 = por %p81_p2, %p80_p0  ;;  %p493_p6 = por %p87_p4, %p86_p3 }
  0x10   : > { %p259_p7 = scmp.ge.s32.totalorder %s422_s18, 1  ;;  %p94_p8 = scmp.lt.s32.totalorder %s422_s18, 4 }
  0x11   : > { %s568_s25 = scalar_select %p493_p6, 1, 0 }
  0x12   : > { %p284_p9 = scmp.eq.s32.totalorder %s472_s0, 0  ;;  %p500_p10 = pnand %p259_p7, %p94_p8 }
  0x13   : > { %s425_s27 = smov [#allocation4]  }
  0x14   : > { %s110_s28 = sshll.u32 %s425_s27, 4  ;;  %p276_p11 = pneg %p500_p10  ;;  %s111_s28 = int_to_ptr.vmem [resolvable:$true] %s110_s28 }
  0x15   : > { %s341_s29 = scalar_lea.vmem %s111_s28, 128  ;;  %p349_p3 = scmp.lt.s32.totalorder %s111_s28, %s111_s28 }
  0x16   : > { %p277_p12 = pnand %p284_p9, %p276_p11  ;;  %p342_p0 = scmp.ne.s32.totalorder %s111_s28, %s341_s29 }
  0x17   : > { %p350_p4 = scmp.lt.s32.totalorder %s341_s29, %s341_s29 }
  0x18   : > { %p332_p13 = pneg %p277_p12 }
  0x19   : > { %p351_p6 = por %p350_p4, %p349_p3 }
  0x1a   : > { %p344_p1 = pnand %p342_p0, %p332_p13 }
  0x1c   : > { %p345_p2 = pneg %p344_p1 }
  0x1e   : > { %p352_p7 = pnand %p351_p6, %p345_p2 }
  0x20   : > { %355 = shalt.err (!%p352_p7)
}
  0x21   : > { %279 = dma.hbm_to_vmem [thread:$0]  (!%p277_p12), %s565_s2, 128, %s111_s28, [#allocation5]  }
  0x22   : > { %123 = sbr.rel (%p500_p10) target bundleno = 420 (0x1a4), region = 28 }
  0x27   : > { %401 = dma.done.wait (%p284_p9), [#allocation5], 128  }
  0x28   : > { %403 = vsyncadd (%p284_p9), [#allocation5], 4294967168  ;;  %s140_s5 = sld [smem:[#allocation3 + %s472_s0]]  ;;  %v141_v0 = vld [vmem:[%s564_s1] sm:$0x1]  ;;  %vm147_vm2 = vcmask 1040384   ;;  %v178_v21 = vlaneseq }
  0x29   : > { %vm142_vm0 = vcmp.ge.s32.totalorder %v141_v0, 0  ;;  %s137_s8 = sand.u32 1, %s414_s16   ;;  %v426_v25 = vmov 0   ;;  %s265_s11 = sshll.u32 %s472_s0, 7  ;;  %v176_v27 = vld [vmem:[#allocation4] sm:$0xff] }
  0x2a   : > { %v179_v22 = vshrl.u32 %v178_v21, 7  ;;  %s263_s9 = sshll.u32 %s137_s8, 3  ;;  %s528_s21 = scalar_lea.hbm %s566_s3, %s265_s11 }
  0x2b   : > { %s139_s12 = scalar_lea.vmem [#allocation7], %s263_s9  ;;  %s186_s22 = scalar_lea.sflag [#allocation6], %s137_s8 }
  0x2c   : > { %v180_v24 = vsub.s32 0, %v179_v22  ;;  %s199_s13 = sshll.u32 %s139_s12, 4  ;;  %s427_s0 = smov [#allocation7]   ;;  %s200_s13 = int_to_ptr.vmem [resolvable:$true] %s199_s13 }
  0x2d   : > { %s356_s26 = scalar_lea.vmem %s200_s13, 128  ;;  %s360_s27 = sshll.u32 %s427_s0, 4  ;;  %s361_s27 = int_to_ptr.vmem [resolvable:$false] %s360_s27 }
  0x2e   : > { %v143_v1 = vstv %s140_s5  ;;  %p357_p6 = scmp.ne.s32.totalorder %s200_s13, %s356_s26  ;;  %s362_s28 = scalar_lea.vmem %s361_s27, 256 }
  0x2f   : > { %vm144_vm1 = vcmp.le.s32.totalorder %v141_v0, %v143_v1  ;;  %p363_p10 = scmp.lt.s32.totalorder %s200_s13, %s361_s27  ;;  %p364_p11 = scmp.lt.s32.totalorder %s362_s28, %s356_s26 }
  0x30   : > { %vm145_vm3 = vmand %vm144_vm1, %vm142_vm0  ;;  %p358_p8 = pnand %p357_p6, %p489_p5 }
  0x31   : > { %v146_v2 = vsel %vm145_vm3, %v141_v0, 4294967295  ;;  %p365_p12 = por %p364_p11, %p363_p10 }
  0x32   : > { %v148_v3 = vsel %vm147_vm2, %v146_v2, 2147483648  ;;  %p359_p9 = pneg %p358_p8 }
  0x33   : > { %v150_v4 = vshra.s32 %v148_v3, 16  ;;  %v149_v6 = vand.u32 65535, %v148_v3 }
  0x34   : > { %p366_p13 = pnand %p365_p12, %p359_p9 }
  0x35   : > { %v152_v5 = vcvt.s32.f32 %v150_v4  ;;  %v151_v7 = vcvt.s32.f32 %v149_v6 }
  0x37   : > { %153 = vmax.xlane.f32.xlu0 %v152_v5 }
  0xc0   : > { %v154_v8 = vpop.xlane.xlu0 %153 }
  0xc1   : > { %vm155_vm4 = vcmp.eq.f32.partialorder %v152_v5, %v154_v8  ;;  %v160_v10 = vcvt.f32.s32 %v154_v8 }
  0xc2   : > { %v156_v9 = vsel %vm155_vm4, %v151_v7, -inf }
  0xc3   : > { %157 = vmax.xlane.f32.xlu0 %v156_v9  ;;  %v161_v12 = vshll.u32 %v160_v10, 16 }
 0x14c   : > { %v158_v11 = vpop.xlane.xlu0 %157 }
 0x14d   : > { %v159_v13 = vcvt.f32.s32 %v158_v11 }
 0x14f   : > { %v162_v14 = vadd.s32 %v161_v12, %v159_v13 }
 0x151   : > { %v163_v15 = vrot.slane %v162_v14, 4 }
 0x153   : > { %vm164_vm5 = vcmp.gt.s32.totalorder %v162_v14, %v163_v15 }
 0x154   : > { %v165_v16 = vsel %vm164_vm5, %v162_v14, %v163_v15 }
 0x155   : > { %v166_v17 = vrot.slane %v165_v16, 2 }
 0x157   : > { %vm167_vm6 = vcmp.gt.s32.totalorder %v165_v16, %v166_v17 }
 0x158   : > { %v168_v18 = vsel %vm167_vm6, %v165_v16, %v166_v17 }
 0x159   : > { %v169_v19 = vrot.slane %v168_v18, 1 }
 0x15b   : > { %vm170_vm7 = vcmp.gt.s32.totalorder %v168_v18, %v169_v19 }
 0x15c   : > { %v171_v20 = vsel %vm170_vm7, %v168_v18, %v169_v19 }
 0x15d   : > { %268 = vpush %v171_v20 }
 0x18e   : > { %s269_s10 = spop %268 }
 0x18f   : > { %v173_v23 = vstv %s269_s10 }
 0x190   : > { %vm174_vm8 = vcmp.eq.s32.totalorder %v141_v0, %v173_v23 }
 0x191   : > { %vm175_vm9 = vmand %vm174_vm8, %vm142_vm0 }
 0x192   : > { %v177_v26 = vsel %vm175_vm9, 1, %v426_v25 }
 0x193   : > { %v181_v28 = vrot.slane %v177_v26, %v180_v24 }
 0x195   : > { %vm182_vm10 = vcmp.eq.s32.totalorder %v181_v28, 1 }
 0x196   : > { %v183_v29 = vsel %vm182_vm10, %v176_v27, 0 }
 0x197   : > { %184 = vst [vmem:[%s139_s12] sm:$0xff] %v183_v29 }
 0x198   : > { %369 = shalt.err (!%p366_p13)
}
 0x199   : > { %s370_s29 = scalar_lea.hbm %s528_s21, 128  ;;  %s374_s5 = scalar_lea.hbm %s566_s3, 384 }
 0x19a   : > { %p371_p0 = scmp.ne.s32.totalorder %s528_s21, %s370_s29  ;;  %p375_p3 = scmp.lt.s32.totalorder %s528_s21, %s566_s3 }
 0x19b   : > { %p376_p4 = scmp.lt.s32.totalorder %s374_s5, %s370_s29 }
 0x19c   : > { %p372_p1 = pnand %p371_p0, %p489_p5 }
 0x19d   : > { %p377_p7 = por %p376_p4, %p375_p3 }
 0x19e   : > { %p373_p2 = pneg %p372_p1 }
 0x1a0   : > { %p378_p6 = pnand %p377_p7, %p373_p2 }
 0x1a2   : > { %381 = shalt.err (!%p378_p6)
}
 0x1a3   : > { %274 = dma.vmem_to_hbm [thread:$0]  (%p489_p5), %s200_s13, 128, %s528_s21, %s186_s22  }
 0x1a4 PF: > { %p286_p8 = scmp.ge.s32.totalorder %s422_s18, 2  ;;  %s211_s8 = sand.u32 1, %s410_s15  }
 0x1a5   : > { %p570_p9 = scmp.ne.s32.totalorder %s568_s25, 0  ;;  %s212_s9 = scalar_lea.sflag [#allocation6], %s211_s8 }
 0x1a7   : > { %p281_p10 = pnand %p286_p8, %p570_p9 }
 0x1a9   : > { %p282_p11 = pneg %p281_p10 }
 0x1ab   : > { %405 = dma.done.wait (%p282_p11), %s212_s9, 128  }
 0x1ac   : > { %407 = vsyncadd (%p282_p11), %s212_s9, 4294967168  ;;  %p18_p12 = scmp.ge.s32.totalorder %s476_s20, 5   ;;  %s571_s15 = smov %s414_s16 }
 0x1ad   : > { %s572_s16 = smov %s418_s17  ;;  %s573_s17 = smov %s487_s23 }
 0x1ae   : > { %s574_s18 = smov %s476_s20  ;;  %20 = sbr.rel (!%p18_p12) target bundleno = 9 (0x9), region = 65 }
 0x1b3   :  { %217 = vsyncpa [#allocation5], 1 }
 0x1b4   :  { %219 = vsyncpa [#allocation5 + $0x1], 1 }
 0x1b5   :  { %220 = vsyncpa [#allocation6], 1 }
 0x1b6   :  { %222 = vsyncpa [#allocation6 + $0x1], 1 }

</bundles_post_ra>
